<compile_context>
chip_gen: v6e
topology: v6e:2x2x1
jax: 0.10.0
libtpu: 0.0.40
codegen_flags: <defaults>
</compile_context>

<pallas_src>
import math

import jax
import jax.numpy as jnp
from jax.experimental import pallas as pl
from jax.experimental.pallas import tpu as pltpu


_NONLINEARITIES = {
    'relu': lambda x: jnp.maximum(x, 0.0),
    'sine': lambda x: jnp.sin(30.0 * x),
    'sigmoid': jax.nn.sigmoid,
    'tanh': jnp.tanh,
    'selu': jax.nn.selu,
    'softplus': jax.nn.softplus,
    'elu': jax.nn.elu,
}


def _round_up(x, m):
    return ((x + m - 1) // m) * m


def _fold_factor(f_in, f_out, p, num_layers):
    """How many consecutive rows to fold into one 128-lane vector row."""
    def need(f):
        return 128 // math.gcd(f, 128)
    g = math.lcm(need(f_in), need(f_out))
    if g == 1:
        return 1
    d = g * p
    # Only fold when the block-diagonal packed weights stay tiny; otherwise the
    # extra weight bytes / MXU work would outweigh the lane-density win.
    if g <= 16 and num_layers * d * d * 4 <= (2 << 20):
        return g
    return 1


def _choose_tile(m, f_in, f_out, num_layers, p, g, *, target_tm=1024,
                 vmem_budget_bytes=16 * 1024 * 1024):
    """Pick the row-tile size (in original rows) and return a VMEM estimate."""
    mult = 8 * g                      # keeps the folded block sublane-aligned
    d = g * p

    def est(tm):
        tm_g = tm // g
        return 4 * (2 * tm_g * g * f_in          # x tile, double-buffered
                    + 2 * tm_g * g * f_out       # out tile, double-buffered
                    + 2 * num_layers * (d * d + d)   # packed params
                    + 2 * tm_g * d)              # activation working set

    tm = max(mult, (target_tm // mult) * mult)
    while tm > mult and est(tm) > vmem_budget_bytes:
        tm = max(mult, ((tm // 2) // mult) * mult)
    tm = min(tm, _round_up(m, mult))  # tiny problems -> one whole-array block
    return tm, est(tm)


def _pack_params(weights, biases, num_layers, p, g, f_in, f_out):
    """Stack all layers into (L, D, D) / (L, 1, D), block-diagonal over the
    fold factor g and zero-padded, so one resident buffer serves every layer."""
    d = g * p
    w_stacked = jnp.zeros((num_layers, d, d), jnp.float32)
    b_stacked = jnp.zeros((num_layers, 1, d), jnp.float32)
    for l, (w, b) in enumerate(zip(weights, biases)):
        k, n = w.shape
        w = w.astype(jnp.float32)
        b = b.astype(jnp.float32)
        # Layer 0 reads input columns packed at stride f_in (raw HBM fold); the
        # last layer writes its outputs packed at stride f_out so the final
        # activation is already in the lane-dense output layout.
        in_stride = f_in if l == 0 else p
        out_stride = f_out if l == num_layers - 1 else p
        for j in range(g):
            w_stacked = w_stacked.at[
                l, j * in_stride:j * in_stride + k,
                j * out_stride:j * out_stride + n].set(w)
            b_stacked = b_stacked.at[
                l, 0, j * out_stride:j * out_stride + n].set(b)
    return w_stacked, b_stacked


def _make_fcblock_kernel(num_layers, d, k_first, n_last, in_width, out_width,
                         nonlinearity, outermost_linear):
    nl = _NONLINEARITIES[nonlinearity]

    def kernel(x_ref, w_ref, b_ref, o_ref):
        h = x_ref[...].astype(jnp.float32)           # (tm_g, in_width), lane-dense
        if in_width < k_first:                       # only g==1 with unaligned f_in
            pad = jnp.zeros((h.shape[0], k_first - in_width), jnp.float32)
            h = jnp.concatenate([h, pad], axis=-1)
        for layer in range(num_layers):              # fused all-layers-per-tile
            k = k_first if layer == 0 else d
            n = n_last if layer == num_layers - 1 else d
            if k == d and n == d:
                w = w_ref[layer]                     # (D, D) block-diag
            else:
                # Static, tile-aligned slice of the packed weight: avoids padding
                # the activation and shrinks the first/last matmul.
                w = w_ref[layer, pl.ds(0, k), pl.ds(0, n)]
            b = b_ref[layer] if n == d else b_ref[layer, :, pl.ds(0, n)]
            h = jnp.dot(h, w, preferred_element_type=jnp.float32) + b
            is_last = layer == num_layers - 1
            if not (is_last and outermost_linear):
                h = nl(h)
        o_ref[...] = h[:, :out_width].astype(o_ref.dtype)   # lane-dense store

    return kernel


def fcblock_forward(coords, weights, biases, *, outermost_linear=False,
                    nonlinearity='relu', target_tm=1024):
    """Run the fused FCBlock forward as a single Pallas kernel."""
    num_layers = len(weights)
    f_in = weights[0].shape[0]
    f_out = weights[-1].shape[1]
    p = _round_up(max([f_in] + [w.shape[1] for w in weights]), 8)
    g = _fold_factor(f_in, f_out, p, num_layers)
    d = g * p
    g_f_in = g * f_in
    g_f_out = g * f_out
    # First/last-layer weight slice extents.  When they are tile-aligned we
    # slice the packed weight; otherwise fall back to the full padded width.
    k_first = g_f_in if g_f_in % 8 == 0 else d
    n_last = g_f_out if (g_f_out == d or g_f_out % 128 == 0) else d

    lead_shape = coords.shape[:-1]
    m = 1
    for s in lead_shape:
        m *= s
    x2d = coords.reshape(m, f_in)

    tm, vmem_est = _choose_tile(m, f_in, f_out, num_layers, p, g,
                                target_tm=target_tm)
    m_pad = _round_up(m, tm)
    if m_pad != m:
        x2d = jnp.concatenate(
            [x2d, jnp.zeros((m_pad - m, f_in), x2d.dtype)], axis=0)

    tm_g = tm // g
    # Free row-major refold: g consecutive rows share one 128-lane vector row.
    x_fold = x2d.reshape(m_pad // g, g_f_in)

    w_stacked, b_stacked = _pack_params(weights, biases, num_layers, p, g,
                                        f_in, f_out)

    grid = (m_pad // tm,)
    in_specs = [
        pl.BlockSpec((tm_g, g_f_in), lambda i: (i, 0)),
        pl.BlockSpec((num_layers, d, d), lambda i: (0, 0, 0)),
        pl.BlockSpec((num_layers, 1, d), lambda i: (0, 0, 0)),
    ]
    out_spec = pl.BlockSpec((tm_g, g_f_out), lambda i: (i, 0))
    out_shape = jax.ShapeDtypeStruct((m_pad // g, g_f_out), coords.dtype)

    kernel = _make_fcblock_kernel(num_layers, d, k_first, n_last,
                                  g_f_in, g_f_out, nonlinearity,
                                  outermost_linear)

    vmem_limit = int(min(max(2 * vmem_est, 16 * 1024 * 1024),
                         48 * 1024 * 1024))

    out = pl.pallas_call(
        kernel,
        out_shape=out_shape,
        grid_spec=pltpu.PrefetchScalarGridSpec(
            num_scalar_prefetch=0,
            grid=grid,
            in_specs=in_specs,
            out_specs=out_spec,
        ),
        compiler_params=pltpu.CompilerParams(
            dimension_semantics=("parallel",),
            vmem_limit_bytes=vmem_limit,
        ),
    )(x_fold, w_stacked, b_stacked)

    out2d = out.reshape(m_pad, f_out)[:m]
    return out2d.reshape(*lead_shape, f_out)


def init_fcblock_params(key, in_features, out_features, num_hidden_layers,
                        hidden_features):
    """Matches init_weights_normal (kaiming normal, fan_in, relu => std =
    sqrt(2 / fan_in)) and nn.Linear's default bias init."""
    dims = ([in_features] + [hidden_features] * (num_hidden_layers + 1)
            + [out_features])
    weights, biases = [], []
    for layer in range(len(dims) - 1):
        fan_in, fan_out = dims[layer], dims[layer + 1]
        key, kw, kb = jax.random.split(key, 3)
        std = math.sqrt(2.0 / fan_in)
        # stored as [in, out] (transposed vs. PyTorch's (out, in))
        w = std * jax.random.normal(kw, (fan_in, fan_out), dtype=jnp.float32)
        bound = 1.0 / math.sqrt(fan_in)
        b = jax.random.uniform(kb, (fan_out,), dtype=jnp.float32,
                               minval=-bound, maxval=bound)
        weights.append(w)
        biases.append(b)
    return weights, biases


def fcblock_reference(coords, weights, biases, *, outermost_linear=False,
                      nonlinearity='relu'):
    """Plain-JAX reference with identical semantics (uses the original,
    unpadded / unfolded parameters)."""
    nl = _NONLINEARITIES[nonlinearity]
    h = coords.astype(jnp.float32)
    num_layers = len(weights)
    for layer, (w, b) in enumerate(zip(weights, biases)):
        h = jnp.matmul(h, w) + b
        is_last = layer == num_layers - 1
        if not (is_last and outermost_linear):
            h = nl(h)
    return h.astype(coords.dtype)


if __name__ == "__main__":
    # FCBlock(in_features=16, out_features=16, num_hidden_layers=1,
    #         hidden_features=32, nonlinearity='relu', outermost_linear=False)
    in_features = 16
    out_features = 16
    hidden_features = 32
    num_hidden_layers = 1
    outermost_linear = False
    nonlinearity = 'relu'

    key = jax.random.PRNGKey(0)
    kx, kp = jax.random.split(key)

    batch, num_points = 2, 64
    coords = jax.random.normal(kx, (batch, num_points, in_features),
                               dtype=jnp.float32)

    weights, biases = init_fcblock_params(
        kp, in_features, out_features, num_hidden_layers, hidden_features)

    out = fcblock_forward(coords, weights, biases,
                          outermost_linear=outermost_linear,
                          nonlinearity=nonlinearity)
    out = jax.block_until_ready(out)

    ref = fcblock_reference(coords, weights, biases,
                            outermost_linear=outermost_linear,
                            nonlinearity=nonlinearity)
    ref = jax.block_until_ready(ref)

    assert out.shape == (batch, num_points, out_features)
    assert jnp.allclose(out, ref, atol=1e-4, rtol=1e-4), (
        float(jnp.max(jnp.abs(out - ref))))
    print("KERNEL_OK")
</pallas_src>

<mosaic_0001>
module attributes {stable_mosaic.version = 11 : i64} {
  func.func @kernel(%arg0: i32, %arg1: memref<16x128xf32, #tpu.memory_space<vmem>>, %arg2: memref<3x256x256xf32, #tpu.memory_space<vmem>>, %arg3: memref<3x1x256xf32, #tpu.memory_space<vmem>>, %arg4: memref<16x128xf32, #tpu.memory_space<vmem>>) attributes {dimension_semantics = [#tpu.dimension_semantics<parallel>], iteration_bounds = array<i64: 1>, scalar_prefetch = 0 : i64, scratch_operands = 0 : i64, tpu.core_type = #tpu.core_type<tc>, window_params = [{transform_indices = @transform_0, window_bounds = array<i64: 16, 128>}, {pipeline_mode = #tpu.pipeline_mode<synchronous>, transform_indices = @transform_1, window_bounds = array<i64: 3, 256, 256>}, {pipeline_mode = #tpu.pipeline_mode<synchronous>, transform_indices = @transform_2, window_bounds = array<i64: 3, 1, 256>}, {transform_indices = @transform_3, window_bounds = array<i64: 16, 128>}]} {
    %c0 = arith.constant 0 : index
    %c0_0 = arith.constant 0 : index
    %0 = vector.load %arg1[%c0, %c0_0] : memref<16x128xf32, #tpu.memory_space<vmem>>, vector<16x128xf32>
    %c0_1 = arith.constant 0 : index
    %c0_2 = arith.constant 0 : index
    %c0_3 = arith.constant 0 : index
    %1 = vector.load %arg2[%c0_1, %c0_2, %c0_3] : memref<3x256x256xf32, #tpu.memory_space<vmem>>, vector<1x128x256xf32>
    %2 = vector.shape_cast %1 : vector<1x128x256xf32> to vector<128x256xf32>
    %c0_4 = arith.constant 0 : index
    %c0_5 = arith.constant 0 : index
    %c0_6 = arith.constant 0 : index
    %3 = vector.load %arg3[%c0_4, %c0_5, %c0_6] : memref<3x1x256xf32, #tpu.memory_space<vmem>>, vector<1x1x256xf32>
    %4 = vector.shape_cast %3 : vector<1x1x256xf32> to vector<1x256xf32>
    %cst = arith.constant dense<0.000000e+00> : vector<16x256xf32>
    %5 = tpu.matmul %0, %2, %cst {dimension_numbers = #tpu.dot_dimension_numbers<[1], [0], [0], [1], [0, 0, 1, 1], [], []>} : vector<16x128xf32>, vector<128x256xf32>, vector<16x256xf32> -> vector<16x256xf32>
    %6 = vector.broadcast %4 : vector<1x256xf32> to vector<16x256xf32>
    %7 = arith.addf %5, %6 : vector<16x256xf32>
    %cst_7 = arith.constant 0.000000e+00 : f32
    %8 = vector.broadcast %cst_7 : f32 to vector<16x256xf32>
    %9 = arith.maximumf %7, %8 : vector<16x256xf32>
    %c1 = arith.constant 1 : index
    %c0_8 = arith.constant 0 : index
    %c0_9 = arith.constant 0 : index
    %10 = vector.load %arg2[%c1, %c0_8, %c0_9] : memref<3x256x256xf32, #tpu.memory_space<vmem>>, vector<1x256x256xf32>
    %11 = vector.shape_cast %10 : vector<1x256x256xf32> to vector<256x256xf32>
    %c1_10 = arith.constant 1 : index
    %c0_11 = arith.constant 0 : index
    %c0_12 = arith.constant 0 : index
    %12 = vector.load %arg3[%c1_10, %c0_11, %c0_12] : memref<3x1x256xf32, #tpu.memory_space<vmem>>, vector<1x1x256xf32>
    %13 = vector.shape_cast %12 : vector<1x1x256xf32> to vector<1x256xf32>
    %cst_13 = arith.constant dense<0.000000e+00> : vector<16x256xf32>
    %14 = tpu.matmul %9, %11, %cst_13 {dimension_numbers = #tpu.dot_dimension_numbers<[1], [0], [0], [1], [0, 0, 1, 1], [], []>} : vector<16x256xf32>, vector<256x256xf32>, vector<16x256xf32> -> vector<16x256xf32>
    %15 = vector.broadcast %13 : vector<1x256xf32> to vector<16x256xf32>
    %16 = arith.addf %14, %15 : vector<16x256xf32>
    %cst_14 = arith.constant 0.000000e+00 : f32
    %17 = vector.broadcast %cst_14 : f32 to vector<16x256xf32>
    %18 = arith.maximumf %16, %17 : vector<16x256xf32>
    %c2 = arith.constant 2 : index
    %c0_15 = arith.constant 0 : index
    %c0_16 = arith.constant 0 : index
    %19 = vector.load %arg2[%c2, %c0_15, %c0_16] : memref<3x256x256xf32, #tpu.memory_space<vmem>>, vector<1x256x128xf32>
    %20 = vector.shape_cast %19 : vector<1x256x128xf32> to vector<256x128xf32>
    %c2_17 = arith.constant 2 : index
    %c0_18 = arith.constant 0 : index
    %c0_19 = arith.constant 0 : index
    %21 = vector.load %arg3[%c2_17, %c0_18, %c0_19] : memref<3x1x256xf32, #tpu.memory_space<vmem>>, vector<1x1x128xf32>
    %22 = vector.shape_cast %21 : vector<1x1x128xf32> to vector<1x128xf32>
    %cst_20 = arith.constant dense<0.000000e+00> : vector<16x128xf32>
    %23 = tpu.matmul %18, %20, %cst_20 {dimension_numbers = #tpu.dot_dimension_numbers<[1], [0], [0], [1], [0, 0, 1, 1], [], []>} : vector<16x256xf32>, vector<256x128xf32>, vector<16x128xf32> -> vector<16x128xf32>
    %24 = vector.broadcast %22 : vector<1x128xf32> to vector<16x128xf32>
    %25 = arith.addf %23, %24 : vector<16x128xf32>
    %cst_21 = arith.constant 0.000000e+00 : f32
    %26 = vector.broadcast %cst_21 : f32 to vector<16x128xf32>
    %27 = arith.maximumf %25, %26 : vector<16x128xf32>
    %c0_22 = arith.constant 0 : index
    %c0_23 = arith.constant 0 : index
    %28 = vector.load %arg4[%c0_22, %c0_23] : memref<16x128xf32, #tpu.memory_space<vmem>>, vector<16x128xf32>
    tpu.vector_store %arg4[%c0_22, %c0_23], %27 {strides = array<i32>} : memref<16x128xf32, #tpu.memory_space<vmem>>, vector<16x128xf32>,
    return
  }
  func.func @transform_0(%arg0: i32) -> (i32, i32) {
    %c0_i32 = arith.constant 0 : i32
    %c0_i32_0 = arith.constant 0 : i32
    return %arg0, %c0_i32 : i32, i32
  }
  func.func @transform_1(%arg0: i32) -> (i32, i32, i32) {
    %c0_i32 = arith.constant 0 : i32
    %c0_i32_0 = arith.constant 0 : i32
    %c0_i32_1 = arith.constant 0 : i32
    %c0_i32_2 = arith.constant 0 : i32
    return %c0_i32, %c0_i32_0, %c0_i32_1 : i32, i32, i32
  }
  func.func @transform_2(%arg0: i32) -> (i32, i32, i32) {
    %c0_i32 = arith.constant 0 : i32
    %c0_i32_0 = arith.constant 0 : i32
    %c0_i32_1 = arith.constant 0 : i32
    %c0_i32_2 = arith.constant 0 : i32
    return %c0_i32, %c0_i32_0, %c0_i32_1 : i32, i32, i32
  }
  func.func @transform_3(%arg0: i32) -> (i32, i32) {
    %c0_i32 = arith.constant 0 : i32
    %c0_i32_0 = arith.constant 0 : i32
    return %arg0, %c0_i32 : i32, i32
  }
}

</mosaic_0001>

<bundles_post_ra>
// kernel: tpu_custom_call.1
= control target key start
LH: loop header
LB: loop body
LE: loop exit
PB: predicated region body
PF: predicated region fallthrough
CT: control target
= control target key end

     0   :  { %8 = vsyncpa [#allocation3], 0  ;;  %s667_s0 = inlined_call_operand.hbm [shape: f32[16,128], index: 0, kind: input, shape index: {}]   ;;  %s668_s1 = inlined_call_operand.hbm [shape: f32[3,256,256], index: 1, kind: input, shape index: {}]   ;;  %s669_s2 = inlined_call_operand.hbm [shape: f32[3,1,256], index: 2, kind: input, shape index: {}]   ;;  %s670_s3 = inlined_call_operand.hbm [shape: f32[16,128], index: 3, kind: output, shape index: {}]  }
   0x1   :  { %9 = vsyncpa [#allocation6], 0 }
   0x2   :  { %10 = vsyncpa [#allocation4], 0  ;;  %s616_s12 = smov [#allocation5]  }
   0x3   :  { %s28_s13 = sshll.u32 %s616_s12, 4  ;;  %s29_s13 = int_to_ptr.vmem [resolvable:$true] %s28_s13 }
   0x4   :  { %s538_s14 = scalar_lea.vmem %s29_s13, 24576  ;;  %p543_p1 = scmp.lt.s32.totalorder %s29_s13, %s29_s13 }
   0x5   :  { %p539_p0 = scmp.ne.s32.totalorder %s29_s13, %s538_s14  ;;  %p544_p2 = scmp.lt.s32.totalorder %s538_s14, %s538_s14 }
   0x7   :  { %p545_p3 = por %p544_p2, %p543_p1 }
   0x9   :  { %p546_p4 = pnand %p545_p3, %p539_p0 }
   0xb   :  { %549 = shalt.err (!%p546_p4)
}
   0xc   :  { %s617_s15 = smov 256   ;;  %s618_s16 = smov 16  }
   0xd   :  { %34 = dma.hbm_to_vmem [thread:$0]  %s668_s1, 24576, %s29_s13, [#allocation6], %s617_s15, %s617_s15, %s618_s16  }
   0xe   :  { %s619_s19 = smov [#allocation2]  }
   0xf   :  { %s16_s20 = sshll.u32 %s619_s19, 4  ;;  %s17_s20 = int_to_ptr.vmem [resolvable:$true] %s16_s20 }
  0x10   :  { %s558_s21 = scalar_lea.vmem %s17_s20, 256  ;;  %p563_p6 = scmp.lt.s32.totalorder %s17_s20, %s17_s20 }
  0x11   :  { %p559_p5 = scmp.ne.s32.totalorder %s17_s20, %s558_s21  ;;  %p564_p7 = scmp.lt.s32.totalorder %s558_s21, %s558_s21 }
  0x13   :  { %p565_p8 = por %p564_p7, %p563_p6 }
  0x15   :  { %p566_p9 = pnand %p565_p8, %p559_p5 }
  0x17   :  { %569 = shalt.err (!%p566_p9)
}
  0x18   :  { %s620_s22 = smov 128   ;;  %s621_s23 = smov 8  }
  0x19   :  { %22 = dma.hbm_to_vmem [thread:$0]  %s667_s0, 256, %s17_s20, [#allocation3], %s620_s22, %s620_s22, %s621_s23  }
  0x1a   :  { %s622_s1 = smov [#allocation7]  }
  0x1b   :  { %s40_s26 = sshll.u32 %s622_s1, 4  ;;  %s41_s26 = int_to_ptr.vmem [resolvable:$true] %s40_s26 }
  0x1c   :  { %s578_s27 = scalar_lea.vmem %s41_s26, 96  ;;  %p583_p11 = scmp.lt.s32.totalorder %s41_s26, %s41_s26 }
  0x1d   :  { %p579_p10 = scmp.ne.s32.totalorder %s41_s26, %s578_s27  ;;  %p584_p12 = scmp.lt.s32.totalorder %s578_s27, %s578_s27 }
  0x1f   :  { %p585_p13 = por %p584_p12, %p583_p11 }
  0x21   :  { %p586_p0 = pnand %p585_p13, %p579_p10 }
  0x23   :  { %589 = shalt.err (!%p586_p0)
}
  0x24   :  { %s623_s28 = smov 32   ;;  %s624_s29 = smov 2  }
  0x25   :  { %46 = dma.hbm_to_vmem [thread:$0]  %s669_s2, 96, %s41_s26, [#allocation6], %s623_s28, %s623_s28, %s624_s29  }
  0x26   :  { %610 = dma.done.wait [#allocation3], 256  }
  0x27   :  { %611 = vsyncadd [#allocation3], 4294967040 }
  0x28   :  { %612 = dma.done.wait [#allocation6], 24672  }
  0x29   :  { %613 = vsyncadd [#allocation6], 4294942624  ;;  %v625_v0 = vmov 0.0   ;;  %v89_v1 = vld [vmem:[#allocation5 + $0xf8] sm:$0xff]  ;;  %v88_v2 = vld [vmem:[#allocation5 + $0xf0] sm:$0xff]  ;;  %s626_s0 = smov [#allocation8]  }
  0x2a   :  { %166 = vmatprep.mubr.f32.mxu0 %v625_v0  ;;  %v87_v3 = vld [vmem:[#allocation5 + $0xe8] sm:$0xff]  ;;  %102 = vmatprep.subr.mxu0 %v89_v1  ;;  %v86_v4 = vld [vmem:[#allocation5 + $0xe0] sm:$0xff]  ;;  %v85_v5 = vld [vmem:[#allocation5 + $0xd8] sm:$0xff]  ;;  %s467_s2 = sshll.u32 %s626_s0, 4  ;;  %s468_s2 = int_to_ptr.vmem [resolvable:$true] %s467_s2 }
  0x2b   :  { %103 = vmatpush1.msra.mxu0 %v88_v2  ;;  %v84_v6 = vld [vmem:[#allocation5 + $0xd0] sm:$0xff]  ;;  %v83_v7 = vld [vmem:[#allocation5 + $0xc8] sm:$0xff]  ;;  %v82_v8 = vld [vmem:[#allocation5 + $0xc0] sm:$0xff]  ;;  %s590_s5 = scalar_lea.vmem %s468_s2, 256  ;;  %p595_p2 = scmp.lt.s32.totalorder %s468_s2, %s468_s2 }
  0x2c   :  { %104 = vmatprep.subr.mxu0 %v87_v3  ;;  %v81_v9 = vld [vmem:[#allocation5 + $0xb8] sm:$0xff]  ;;  %v80_v10 = vld [vmem:[#allocation5 + $0xb0] sm:$0xff]  ;;  %v79_v11 = vld [vmem:[#allocation5 + $0xa8] sm:$0xff]  ;;  %p591_p1 = scmp.ne.s32.totalorder %s468_s2, %s590_s5  ;;  %p596_p3 = scmp.lt.s32.totalorder %s590_s5, %s590_s5 }
  0x2d   :  { %105 = vmatpush1.msra.mxu0 %v86_v4  ;;  %v78_v12 = vld [vmem:[#allocation5 + $0xa0] sm:$0xff]  ;;  %v77_v13 = vld [vmem:[#allocation5 + $0x98] sm:$0xff]  ;;  %v76_v14 = vld [vmem:[#allocation5 + $0x90] sm:$0xff] }
  0x2e   :  { %106 = vmatprep.subr.mxu0 %v85_v5  ;;  %v215_v15 = vld [vmem:[#allocation5 + $0x2f8] sm:$0xff]  ;;  %v214_v16 = vld [vmem:[#allocation5 + $0x2f0] sm:$0xff]  ;;  %v75_v17 = vld [vmem:[#allocation5 + $0x88] sm:$0xff]  ;;  %p597_p4 = por %p596_p3, %p595_p2 }
  0x2f   :  { %107 = vmatpush1.msra.mxu0 %v84_v6  ;;  %261 = vmatprep.subr.mxu1 %v215_v15  ;;  %v213_v18 = vld [vmem:[#allocation5 + $0x2e8] sm:$0xff]  ;;  %v212_v19 = vld [vmem:[#allocation5 + $0x2e0] sm:$0xff]  ;;  %v211_v21 = vld [vmem:[#allocation5 + $0x2d8] sm:$0xff] }
  0x30   :  { %108 = vmatprep.subr.mxu0 %v83_v7  ;;  %v74_v20 = vld [vmem:[#allocation5 + $0x80] sm:$0xff]  ;;  %262 = vmatpush1.msra.mxu1 %v214_v16  ;;  %v73_v22 = vld [vmem:[#allocation5 + $0x78] sm:$0xff]  ;;  %v210_v23 = vld [vmem:[#allocation5 + $0x2d0] sm:$0xff]  ;;  %p598_p5 = pnand %p597_p4, %p591_p1 }
  0x31   :  { %109 = vmatpush1.msra.mxu0 %v82_v8  ;;  %263 = vmatprep.subr.mxu1 %v213_v18  ;;  %v72_v24 = vld [vmem:[#allocation5 + $0x70] sm:$0xff]  ;;  %v209_v25 = vld [vmem:[#allocation5 + $0x2c8] sm:$0xff]  ;;  %v208_v27 = vld [vmem:[#allocation5 + $0x2c0] sm:$0xff] }
  0x32   :  { %110 = vmatprep.subr.mxu0 %v81_v9  ;;  %264 = vmatpush1.msra.mxu1 %v212_v19  ;;  %v71_v26 = vld [vmem:[#allocation5 + $0x68] sm:$0xff]  ;;  %v70_v28 = vld [vmem:[#allocation5 + $0x60] sm:$0xff]  ;;  %v207_v29 = vld [vmem:[#allocation5 + $0x2b8] sm:$0xff] }
  0x33   :  { %111 = vmatpush1.msra.mxu0 %v80_v10  ;;  %265 = vmatprep.subr.mxu1 %v211_v21  ;;  %v69_v30 = vld [vmem:[#allocation5 + $0x58] sm:$0xff]  ;;  %v206_v31 = vld [vmem:[#allocation5 + $0x2b0] sm:$0xff]  ;;  %v205_v33 = vld [vmem:[#allocation5 + $0x2a8] sm:$0xff] }
  0x34   :  { %112 = vmatprep.subr.mxu0 %v79_v11  ;;  %266 = vmatpush1.msra.mxu1 %v210_v23  ;;  %v68_v32 = vld [vmem:[#allocation5 + $0x50] sm:$0xff]  ;;  %v67_v34 = vld [vmem:[#allocation5 + $0x48] sm:$0xff]  ;;  %v204_v35 = vld [vmem:[#allocation5 + $0x2a0] sm:$0xff] }
  0x35   :  { %113 = vmatpush1.msra.mxu0 %v78_v12  ;;  %267 = vmatprep.subr.mxu1 %v209_v25  ;;  %v66_v36 = vld [vmem:[#allocation5 + $0x40] sm:$0xff]  ;;  %v203_v37 = vld [vmem:[#allocation5 + $0x298] sm:$0xff]  ;;  %v202_v39 = vld [vmem:[#allocation5 + $0x290] sm:$0xff] }
  0x36   :  { %114 = vmatprep.subr.mxu0 %v77_v13  ;;  %268 = vmatpush1.msra.mxu1 %v208_v27  ;;  %v65_v38 = vld [vmem:[#allocation5 + $0x38] sm:$0xff]  ;;  %v64_v40 = vld [vmem:[#allocation5 + $0x30] sm:$0xff]  ;;  %v201_v41 = vld [vmem:[#allocation5 + $0x288] sm:$0xff] }
  0x37   :  { %115 = vmatpush1.msra.mxu0 %v76_v14  ;;  %269 = vmatprep.subr.mxu1 %v207_v29  ;;  %v63_v42 = vld [vmem:[#allocation5 + $0x28] sm:$0xff]  ;;  %v200_v43 = vld [vmem:[#allocation5 + $0x280] sm:$0xff]  ;;  %v199_v45 = vld [vmem:[#allocation5 + $0x278] sm:$0xff] }
  0x38   :  { %116 = vmatprep.subr.mxu0 %v75_v17  ;;  %270 = vmatpush1.msra.mxu1 %v206_v31  ;;  %v62_v44 = vld [vmem:[#allocation5 + $0x20] sm:$0xff]  ;;  %v61_v46 = vld [vmem:[#allocation5 + $0x18] sm:$0xff]  ;;  %v198_v47 = vld [vmem:[#allocation5 + $0x270] sm:$0xff] }
  0x39   :  { %117 = vmatpush1.msra.mxu0 %v74_v20  ;;  %271 = vmatprep.subr.mxu1 %v205_v33  ;;  %v60_v48 = vld [vmem:[#allocation5 + $0x10] sm:$0xff]  ;;  %v197_v49 = vld [vmem:[#allocation5 + $0x268] sm:$0xff]  ;;  %v196_v51 = vld [vmem:[#allocation5 + $0x260] sm:$0xff] }
  0x3a   :  { %118 = vmatprep.subr.mxu0 %v73_v22  ;;  %272 = vmatpush1.msra.mxu1 %v204_v35  ;;  %v59_v50 = vld [vmem:[#allocation5 + $0x8] sm:$0xff]  ;;  %v58_v52 = vld [vmem:[#allocation5] sm:$0xff]  ;;  %v195_v53 = vld [vmem:[#allocation5 + $0x258] sm:$0xff] }
  0x3b   :  { %119 = vmatpush1.msra.mxu0 %v72_v24  ;;  %273 = vmatprep.subr.mxu1 %v203_v37  ;;  %v56_v54 = vld [vmem:[#allocation2] sm:$0xff]  ;;  %v193_v56 = vld [vmem:[#allocation5 + $0x248] sm:$0xff]  ;;  %v192_v57 = vld [vmem:[#allocation5 + $0x240] sm:$0xff] }
  0x3c   :  { %120 = vmatprep.subr.mxu0 %v71_v26  ;;  %274 = vmatpush1.msra.mxu1 %v202_v39  ;;  %v194_v55 = vld [vmem:[#allocation5 + $0x250] sm:$0xff]  ;;  %v191_v58 = vld [vmem:[#allocation5 + $0x238] sm:$0xff]  ;;  %v189_v61 = vld [vmem:[#allocation5 + $0x228] sm:$0xff] }
  0x3d   :  { %121 = vmatpush1.msra.mxu0 %v70_v28  ;;  %275 = vmatprep.subr.mxu1 %v201_v41  ;;  %v57_v59 = vld [vmem:[#allocation2 + $0x8] sm:$0xff]  ;;  %v190_v60 = vld [vmem:[#allocation5 + $0x230] sm:$0xff]  ;;  %v188_v62 = vld [vmem:[#allocation5 + $0x220] sm:$0xff] }
  0x3e   :  { %122 = vmatprep.subr.mxu0 %v69_v30  ;;  %276 = vmatpush1.msra.mxu1 %v200_v43  ;;  %v187_v63 = vld [vmem:[#allocation5 + $0x218] sm:$0xff]  ;;  %v186_v1 = vld [vmem:[#allocation5 + $0x210] sm:$0xff]  ;;  %v185_v2 = vld [vmem:[#allocation5 + $0x208] sm:$0xff] }
  0x3f   :  { %123 = vmatpush1.msra.mxu0 %v68_v32  ;;  %277 = vmatprep.subr.mxu1 %v199_v45  ;;  %v184_v3 = vld [vmem:[#allocation5 + $0x200] sm:$0xff]  ;;  %v247_v4 = vld [vmem:[#allocation5 + $0x3f8] sm:$0xff]  ;;  %v245_v5 = vld [vmem:[#allocation5 + $0x3e8] sm:$0xff] }
  0x40   :  { %124 = vmatprep.subr.mxu0 %v67_v34  ;;  %278 = vmatpush1.msra.mxu1 %v198_v47  ;;  %v244_v6 = vld [vmem:[#allocation5 + $0x3e0] sm:$0xff]  ;;  %v243_v7 = vld [vmem:[#allocation5 + $0x3d8] sm:$0xff]  ;;  %v242_v8 = vld [vmem:[#allocation5 + $0x3d0] sm:$0xff] }
  0x41   :  { %125 = vmatpush1.msra.mxu0 %v66_v36  ;;  %279 = vmatprep.subr.mxu1 %v197_v49  ;;  %v241_v9 = vld [vmem:[#allocation5 + $0x3c8] sm:$0xff]  ;;  %v240_v10 = vld [vmem:[#allocation5 + $0x3c0] sm:$0xff]  ;;  %v239_v11 = vld [vmem:[#allocation5 + $0x3b8] sm:$0xff] }
  0x42   :  { %126 = vmatprep.subr.mxu0 %v65_v38  ;;  %280 = vmatpush1.msra.mxu1 %v196_v51  ;;  %v238_v12 = vld [vmem:[#allocation5 + $0x3b0] sm:$0xff]  ;;  %v237_v13 = vld [vmem:[#allocation5 + $0x3a8] sm:$0xff]  ;;  %v236_v14 = vld [vmem:[#allocation5 + $0x3a0] sm:$0xff] }
  0x43   :  { %127 = vmatpush1.msra.mxu0 %v64_v40  ;;  %281 = vmatprep.subr.mxu1 %v195_v53  ;;  %v235_v15 = vld [vmem:[#allocation5 + $0x398] sm:$0xff]  ;;  %v234_v16 = vld [vmem:[#allocation5 + $0x390] sm:$0xff]  ;;  %v233_v17 = vld [vmem:[#allocation5 + $0x388] sm:$0xff] }
  0x44   :  { %128 = vmatprep.subr.mxu0 %v63_v42  ;;  %282 = vmatpush1.msra.mxu1 %v194_v55  ;;  %v232_v18 = vld [vmem:[#allocation5 + $0x380] sm:$0xff]  ;;  %v231_v19 = vld [vmem:[#allocation5 + $0x378] sm:$0xff]  ;;  %v230_v20 = vld [vmem:[#allocation5 + $0x370] sm:$0xff] }
  0x45   :  { %129 = vmatpush1.msra.mxu0 %v62_v44  ;;  %283 = vmatprep.subr.mxu1 %v193_v56  ;;  %v229_v21 = vld [vmem:[#allocation5 + $0x368] sm:$0xff]  ;;  %v228_v22 = vld [vmem:[#allocation5 + $0x360] sm:$0xff]  ;;  %v227_v23 = vld [vmem:[#allocation5 + $0x358] sm:$0xff] }
  0x46   :  { %130 = vmatprep.subr.mxu0 %v61_v46  ;;  %284 = vmatpush1.msra.mxu1 %v192_v57  ;;  %v226_v24 = vld [vmem:[#allocation5 + $0x350] sm:$0xff]  ;;  %v225_v25 = vld [vmem:[#allocation5 + $0x348] sm:$0xff]  ;;  %v224_v26 = vld [vmem:[#allocation5 + $0x340] sm:$0xff] }
  0x47   :  { %131 = vmatpush1.msra.mxu0 %v60_v48  ;;  %285 = vmatprep.subr.mxu1 %v191_v58  ;;  %v223_v27 = vld [vmem:[#allocation5 + $0x338] sm:$0xff]  ;;  %v222_v28 = vld [vmem:[#allocation5 + $0x330] sm:$0xff]  ;;  %v221_v29 = vld [vmem:[#allocation5 + $0x328] sm:$0xff] }
  0x48   :  { %132 = vmatprep.subr.mxu0 %v59_v50  ;;  %286 = vmatpush1.msra.mxu1 %v190_v60  ;;  %v220_v30 = vld [vmem:[#allocation5 + $0x320] sm:$0xff]  ;;  %v219_v31 = vld [vmem:[#allocation5 + $0x318] sm:$0xff]  ;;  %v218_v32 = vld [vmem:[#allocation5 + $0x310] sm:$0xff] }
  0x49   :  { %133 = vmatpush1.msra.mxu0 %v58_v52  ;;  %287 = vmatprep.subr.mxu1 %v189_v61  ;;  %v217_v33 = vld [vmem:[#allocation5 + $0x308] sm:$0xff]  ;;  %v216_v34 = vld [vmem:[#allocation5 + $0x300] sm:$0xff]  ;;  %v374_v35 = vld [vmem:[#allocation5 + $0x5f0] sm:$0xff] }
  0x4a   :  { %167 = vmatmul.mubr.f32.vlgmr.msra.gmra.mxu0 %v56_v54  ;;  %288 = vmatpush1.msra.mxu1 %v188_v62  ;;  %v358_v36 = vld [vmem:[#allocation5 + $0x4f0] sm:$0xff]  ;;  %v373_v37 = vld [vmem:[#allocation5 + $0x5e0] sm:$0xff] }
  0x4b   :  { %172 = vmatprep.mubr.f32.mxu0 %v625_v0  ;;  %289 = vmatprep.subr.mxu1 %v187_v63  ;;  %v246_v0 = vld [vmem:[#allocation5 + $0x3f0] sm:$0xff]  ;;  %v357_v38 = vld [vmem:[#allocation5 + $0x4e0] sm:$0xff] }
  0x4c   :  { %290 = vmatpush1.msra.mxu1 %v186_v1  ;;  %481 = vmatprep.subr.mxu0 %v374_v35  ;;  %v372_v39 = vld [vmem:[#allocation5 + $0x5d0] sm:$0xff]  ;;  %v371_v41 = vld [vmem:[#allocation5 + $0x5c0] sm:$0xff] }
  0x4d   :  { %291 = vmatprep.subr.mxu1 %v185_v2  ;;  %482 = vmatpush3.msra.mxu0 %v358_v36  ;;  %v356_v40 = vld [vmem:[#allocation5 + $0x4d0] sm:$0xff]  ;;  %v355_v42 = vld [vmem:[#allocation5 + $0x4c0] sm:$0xff] }
  0x4e   :  { %173 = vmatmul.mubr.f32.gmra.mxu0 %v57_v59  ;;  %292 = vmatpush1.msra.mxu1 %v184_v3  ;;  %v370_v43 = vld [vmem:[#allocation5 + $0x5b0] sm:$0xff]  ;;  %v369_v45 = vld [vmem:[#allocation5 + $0x5a0] sm:$0xff]  ;;  %v92_v59 = vlaneseq }
  0x4f   :  { %293 = vmatprep.subr.mxu1 %v247_v4  ;;  %483 = vmatprep.subr.mxu0 %v373_v37  ;;  %v354_v44 = vld [vmem:[#allocation5 + $0x4b0] sm:$0xff]  ;;  %v353_v46 = vld [vmem:[#allocation5 + $0x4a0] sm:$0xff] }
  0x50   :  { %294 = vmatpush2.msra.mxu1 %v246_v0  ;;  %484 = vmatpush3.msra.mxu0 %v357_v38  ;;  %v368_v47 = vld [vmem:[#allocation5 + $0x590] sm:$0xff]  ;;  %v367_v49 = vld [vmem:[#allocation5 + $0x580] sm:$0xff]  ;;  %v93_v60 = vshrl.u32 %v92_v59, 7 }
  0x51   :  { %295 = vmatprep.subr.mxu1 %v245_v5  ;;  %485 = vmatprep.subr.mxu0 %v372_v39  ;;  %v352_v48 = vld [vmem:[#allocation5 + $0x490] sm:$0xff]  ;;  %v351_v50 = vld [vmem:[#allocation5 + $0x480] sm:$0xff] }
  0x52   :  { %296 = vmatpush2.msra.mxu1 %v244_v6  ;;  %486 = vmatpush3.msra.mxu0 %v356_v40  ;;  %v366_v51 = vld [vmem:[#allocation5 + $0x570] sm:$0xff]  ;;  %v365_v53 = vld [vmem:[#allocation5 + $0x560] sm:$0xff]  ;;  %v94_v61 = vsub.s32 0, %v93_v60  ;;  %v98_v63 = vsub.s32 1, %v93_v60 }
  0x53   :  { %297 = vmatprep.subr.mxu1 %v243_v7  ;;  %487 = vmatprep.subr.mxu0 %v371_v41  ;;  %v350_v52 = vld [vmem:[#allocation5 + $0x470] sm:$0xff]  ;;  %v349_v54 = vld [vmem:[#allocation5 + $0x460] sm:$0xff] }
  0x54   :  { %298 = vmatpush2.msra.mxu1 %v242_v8  ;;  %488 = vmatpush3.msra.mxu0 %v355_v42  ;;  %v364_v55 = vld [vmem:[#allocation5 + $0x550] sm:$0xff]  ;;  %v363_v57 = vld [vmem:[#allocation5 + $0x540] sm:$0xff] }
  0x55   :  { %299 = vmatprep.subr.mxu1 %v241_v9  ;;  %489 = vmatprep.subr.mxu0 %v370_v43  ;;  %v348_v56 = vld [vmem:[#allocation5 + $0x450] sm:$0xff]  ;;  %v347_v58 = vld [vmem:[#allocation5 + $0x440] sm:$0xff] }
  0x56   :  { %300 = vmatpush2.msra.mxu1 %v240_v10  ;;  %490 = vmatpush3.msra.mxu0 %v354_v44  ;;  %v90_v62 = vld [vmem:[#allocation7] sm:$0x3]  ;;  %v480_v38 = vld [vmem:[#allocation7 + $0x4] ss:$0 sm:$0xff] }
  0x57   :  { %301 = vmatprep.subr.mxu1 %v239_v11  ;;  %491 = vmatprep.subr.mxu0 %v369_v45  ;;  %v95_v1 = vrot.slane %v90_v62, %v94_v61  ;;  %v99_v2 = vrot.slane %v90_v62, %v98_v63 }
  0x58   :  { %302 = vmatpush2.msra.mxu1 %v238_v12  ;;  %492 = vmatpush3.msra.mxu0 %v353_v46 }
  0x59   :  { %303 = vmatprep.subr.mxu1 %v237_v13  ;;  %493 = vmatprep.subr.mxu0 %v368_v47 }
  0x5a   :  { %304 = vmatpush2.msra.mxu1 %v236_v14  ;;  %494 = vmatpush3.msra.mxu0 %v352_v48  ;;  %v362_v14 = vld [vmem:[#allocation5 + $0x530] sm:$0xff] }
  0x5b   :  { %305 = vmatprep.subr.mxu1 %v235_v15  ;;  %495 = vmatprep.subr.mxu0 %v367_v49  ;;  %v346_v15 = vld [vmem:[#allocation5 + $0x430] sm:$0xff] }
  0x5c   :  { %306 = vmatpush2.msra.mxu1 %v234_v16  ;;  %496 = vmatpush3.msra.mxu0 %v351_v50  ;;  %v361_v16 = vld [vmem:[#allocation5 + $0x520] sm:$0xff] }
  0x5d   :  { %307 = vmatprep.subr.mxu1 %v233_v17  ;;  %497 = vmatprep.subr.mxu0 %v366_v51  ;;  %v345_v17 = vld [vmem:[#allocation5 + $0x420] sm:$0xff] }
  0x5e   :  { %308 = vmatpush2.msra.mxu1 %v232_v18  ;;  %498 = vmatpush3.msra.mxu0 %v350_v52  ;;  %v360_v18 = vld [vmem:[#allocation5 + $0x510] sm:$0xff] }
  0x5f   :  { %309 = vmatprep.subr.mxu1 %v231_v19  ;;  %499 = vmatprep.subr.mxu0 %v365_v53  ;;  %v344_v19 = vld [vmem:[#allocation5 + $0x410] sm:$0xff] }
  0x60   :  { %310 = vmatpush2.msra.mxu1 %v230_v20  ;;  %500 = vmatpush3.msra.mxu0 %v349_v54  ;;  %v359_v20 = vld [vmem:[#allocation5 + $0x500] sm:$0xff] }
  0x61   :  { %311 = vmatprep.subr.mxu1 %v229_v21  ;;  %501 = vmatprep.subr.mxu0 %v364_v55  ;;  %v343_v21 = vld [vmem:[#allocation5 + $0x400] sm:$0xff] }
  0x62   :  { %312 = vmatpush2.msra.mxu1 %v228_v22  ;;  %502 = vmatpush3.msra.mxu0 %v348_v56  ;;  %v249_v22 = vld [vmem:[#allocation7 + $0x2] sm:$0x3] }
  0x63   :  { %313 = vmatprep.subr.mxu1 %v227_v23  ;;  %503 = vmatprep.subr.mxu0 %v363_v57  ;;  %v254_v23 = vrot.slane %v249_v22, %v94_v61 }
  0x64   :  { %314 = vmatpush2.msra.mxu1 %v226_v24  ;;  %504 = vmatpush3.msra.mxu0 %v347_v58  ;;  %v258_v24 = vrot.slane %v249_v22, %v98_v63 }
  0x65   :  { %315 = vmatprep.subr.mxu1 %v225_v25  ;;  %505 = vmatprep.subr.mxu0 %v362_v14 }
  0x66   :  { %316 = vmatpush2.msra.mxu1 %v224_v26  ;;  %506 = vmatpush3.msra.mxu0 %v346_v15 }
  0x67   :  { %317 = vmatprep.subr.mxu1 %v223_v27  ;;  %507 = vmatprep.subr.mxu0 %v361_v16 }
  0x68   :  { %318 = vmatpush2.msra.mxu1 %v222_v28  ;;  %508 = vmatpush3.msra.mxu0 %v345_v17 }
  0x69   :  { %319 = vmatprep.subr.mxu1 %v221_v29  ;;  %509 = vmatprep.subr.mxu0 %v360_v18 }
  0x6a   :  { %320 = vmatpush2.msra.mxu1 %v220_v30  ;;  %510 = vmatpush3.msra.mxu0 %v344_v19 }
  0x6b   :  { %321 = vmatprep.subr.mxu1 %v219_v31  ;;  %511 = vmatprep.subr.mxu0 %v359_v20 }
  0x6c   :  { %322 = vmatpush2.msra.mxu1 %v218_v32  ;;  %512 = vmatpush3.msra.mxu0 %v343_v21 }
  0x6d   :  { %323 = vmatprep.subr.mxu1 %v217_v33 }
  0x6e   :  { %324 = vmatpush2.msra.mxu1 %v216_v34 }
 0x10a   :  { %v168_v3 = vpop.f32.mrf.mxu0 }
 0x10b   :  { %v169_v4 = vadd.f32 %v168_v3, %v95_v1 }
 0x10c   :  { %v170_v0 = vpop.f32.mrf.mxu0 }
 0x10d   :  { %v171_v5 = vadd.f32 %v170_v0, %v99_v2  ;;  %v179_v8 = vmax.f32 %v169_v4, 0.0 }
 0x10e   :  { %v174_v6 = vpop.f32.mrf.mxu0 }
 0x10f   :  { %v180_v7 = vmax.f32 %v171_v5, 0.0  ;;  %v175_v9 = vadd.f32 %v174_v6, %v95_v1 }
 0x110   :  { %v176_v10 = vpop.f32.mrf.mxu0 }
 0x111   :  { %v177_v11 = vadd.f32 %v176_v10, %v99_v2  ;;  %325 = vmatprep.mubr.f32.mxu1 %v180_v7  ;;  %v181_v13 = vmax.f32 %v175_v9, 0.0 }
 0x112   :  { %326 = vmatmul.mubr.f32.vlgmr.msra.gmra.mxu1 %v179_v8 }
 0x113   :  { %v182_v12 = vmax.f32 %v177_v11, 0.0 }
 0x115   :  { %331 = vmatprep.mubr.f32.mxu1 %v182_v12 }
 0x116   :  { %332 = vmatmul.mubr.f32.gmra.mxu1 %v181_v13 }
 0x1d2   :  { %v327_v25 = vpop.f32.mrf.mxu1 }
 0x1d3   :  { %v328_v26 = vadd.f32 %v327_v25, %v254_v23 }
 0x1d4   :  { %v329_v27 = vpop.f32.mrf.mxu1 }
 0x1d5   :  { %v330_v28 = vadd.f32 %v329_v27, %v258_v24  ;;  %v338_v31 = vmax.f32 %v328_v26, 0.0 }
 0x1d6   :  { %v333_v29 = vpop.f32.mrf.mxu1 }
 0x1d7   :  { %v339_v30 = vmax.f32 %v330_v28, 0.0  ;;  %v334_v32 = vadd.f32 %v333_v29, %v254_v23 }
 0x1d8   :  { %v335_v33 = vpop.f32.mrf.mxu1 }
 0x1d9   :  { %v336_v34 = vadd.f32 %v335_v33, %v258_v24  ;;  %447 = vmatprep.mubr.f32.mxu0 %v339_v30  ;;  %v340_v36 = vmax.f32 %v334_v32, 0.0 }
 0x1da   :  { %448 = vmatmul.mubr.f32.vlgmr.msra.gmra.mxu0 %v338_v31 }
 0x1db   :  { %v341_v35 = vmax.f32 %v336_v34, 0.0 }
 0x1dd   :  { %452 = vmatprep.mubr.f32.mxu0 %v341_v35 }
 0x1de   :  { %453 = vmatmul.mubr.f32.gmra.mxu0 %v340_v36 }
 0x29a   :  { %v513_v37 = vpop.f32.mrf.mxu0 }
 0x29c   :  { %v514_v39 = vpop.f32.mrf.mxu0 }
 0x29d   :  { %v515_v40 = vadd.f32 %v514_v39, %v513_v37 }
 0x29e   :  { %v516_v41 = vpop.f32.mrf.mxu0 }
 0x29f   :  { %v450_v42 = vadd.f32 %v515_v40, %v480_v38 }
 0x2a0   :  { %v517_v43 = vpop.f32.mrf.mxu0 }
 0x2a1   :  { %v458_v44 = vmax.f32 %v450_v42, 0.0  ;;  %v518_v45 = vadd.f32 %v517_v43, %v516_v41 }
 0x2a3   :  { %460 = vst [vmem:[#allocation8] sm:$0xff] %v458_v44  ;;  %v455_v46 = vadd.f32 %v518_v45, %v480_v38 }
 0x2a5   :  { %v459_v47 = vmax.f32 %v455_v46, 0.0 }
 0x2a7   :  { %461 = vst [vmem:[#allocation8 + $0x8] sm:$0xff] %v459_v47 }
 0x2a8   :  { %601 = shalt.err (!%p598_p5)
}
 0x2a9   :  { %473 = dma.vmem_to_hbm [thread:$0]  %s468_s2, 256, %s670_s3, [#allocation4], %s620_s22, %s620_s22, %s621_s23  }
 0x2aa   :  { %614 = dma.done.wait [#allocation4], 256  }
 0x2ab   :  { %615 = vsyncadd [#allocation4], 4294967040 }
 0x2ac   :  { %477 = vsyncpa [#allocation3], 1 }
 0x2ad   :  { %478 = vsyncpa [#allocation6], 1 }
 0x2ae   :  { %479 = vsyncpa [#allocation4], 1 }

</bundles_post_ra>
